<compile_context>
chip_gen: v5e
topology: v5e:2x2
jax: 0.10.0
libtpu: 0.0.40
codegen_flags: <defaults>
</compile_context>

<pallas_src>
import functools
import math

import jax
import jax.numpy as jnp
from jax.experimental import pallas as pl
from jax.experimental.pallas import tpu as pltpu

_TWO_PI = 2.0 * math.pi
_LANE = 128
_SUBLANE = 8
_CHUNK = 512                            # lane chunk for per-chunk proj/sin/cos temporaries
_VMEM_BLOCK_BUDGET = 20 * 1024 * 1024   # bytes of blocks + temporaries per grid step
_VMEM_LIMIT = 32 * 1024 * 1024          # scoped VMEM limit (safe on v5e/v6e/v7x)


def _round_up(n, m):
    return ((n + m - 1) // m) * m


def _gfp_kernel(x_ref, w_ref, out_ref, *, hp, chunk):
    # x_ref: (TM, 1) f32; w_ref: (1, Hp) f32; out_ref: (TM, 2*Hp) out_dtype.
    x = x_ref[...]                                       # (TM, 1), loaded once
    for c0 in range(0, hp, chunk):                       # static chunks -> lane-aligned stores
        cw = min(chunk, hp - c0)
        # Same op order as torch: (x * W) * 2*pi (VPU broadcast mul).
        proj = (x * w_ref[:, c0:c0 + cw]) * _TWO_PI      # (TM, cw)
        out_ref[:, c0:c0 + cw] = jnp.sin(proj).astype(out_ref.dtype)
        out_ref[:, hp + c0:hp + c0 + cw] = jnp.cos(proj).astype(out_ref.dtype)


@functools.partial(jax.jit, static_argnames=("block_rows", "out_dtype"))
def gaussian_fourier_projection(x, W, *, block_rows=1024, out_dtype=jnp.float32):
    """x: (B,) time steps; W: (H,) fixed gaussian features (already scaled).

    Returns (B, 2*H) = concat([sin(2*pi*x*W), cos(2*pi*x*W)], axis=-1).
    """
    B = x.shape[0]
    H = W.shape[0]
    out_bytes = jnp.dtype(out_dtype).itemsize

    if B == 0 or H == 0:
        return jnp.zeros((B, 2 * H), dtype=out_dtype)

    # Pad the feature dim to a lane multiple so both sin/cos half-stores are
    # unmasked, lane-dense vst (no-op when embed_dim % 256 == 0).
    Hp = _round_up(H, _LANE)
    chunk = min(_CHUNK, Hp)

    # Row-tile cap from an explicit per-step VMEM budget: double-buffered output
    # block + double-buffered x block (one lane-padded vreg row each) + per-chunk
    # proj/sin/cos temporaries.
    per_row_bytes = 2 * (2 * Hp * out_bytes) + 2 * (_LANE * 4) + 3 * chunk * 4
    vmem_rows = max(_SUBLANE, (_VMEM_BLOCK_BUDGET // per_row_bytes) // _SUBLANE * _SUBLANE)
    row_cap = max(_SUBLANE, min(block_rows, vmem_rows))

    # Near-even batch split (tiny tail padding) and >= 2 blocks when there is
    # enough work, so both v7x TensorCores stay busy.
    n_blk = pl.cdiv(B, row_cap)
    if B >= 2 * _SUBLANE:
        n_blk = max(n_blk, 2)
    tm = _round_up(pl.cdiv(B, n_blk), _SUBLANE)
    Bp = n_blk * tm

    x2d = x.astype(jnp.float32).reshape(B, 1)
    if Bp != B:
        x2d = jnp.pad(x2d, ((0, Bp - B), (0, 0)))
    w2d = W.astype(jnp.float32).reshape(1, H)
    if Hp != H:
        w2d = jnp.pad(w2d, ((0, 0), (0, Hp - H)))

    kernel = functools.partial(_gfp_kernel, hp=Hp, chunk=chunk)

    out = pl.pallas_call(
        kernel,
        out_shape=jax.ShapeDtypeStruct((Bp, 2 * Hp), out_dtype),
        grid=(n_blk,),
        in_specs=[
            pl.BlockSpec((tm, 1), lambda i: (i, 0)),    # x tile marches over batch
            pl.BlockSpec((1, Hp), lambda i: (0, 0)),    # W resident across all steps
        ],
        out_specs=pl.BlockSpec((tm, 2 * Hp), lambda i: (i, 0)),
        compiler_params=pltpu.CompilerParams(
            dimension_semantics=("parallel",),
            vmem_limit_bytes=_VMEM_LIMIT,
        ),
        cost_estimate=pl.CostEstimate(
            flops=2 * Bp * Hp,
            transcendentals=2 * Bp * Hp,
            bytes_accessed=4 * Bp + 4 * Hp + out_bytes * Bp * 2 * Hp,
        ),
    )(x2d, w2d)

    if Hp == H:
        return out[:B] if Bp != B else out
    # Drop the lane padding: sin half lives in [:, :H], cos half in [:, Hp:Hp+H].
    return jnp.concatenate([out[:B, :H], out[:B, Hp:Hp + H]], axis=-1)


if __name__ == "__main__":
    embed_dim = 32
    scale = 30.0
    batch = 8

    key = jax.random.PRNGKey(0)
    k_w, k_x = jax.random.split(key)

    # Deterministic parameter init (mirrors torch.randn(embed_dim // 2) * scale).
    W = jax.random.normal(k_w, (embed_dim // 2,), dtype=jnp.float32) * scale
    # Example time-step inputs, shape (B,).
    x = jax.random.uniform(k_x, (batch,), dtype=jnp.float32)

    out = gaussian_fourier_projection(x, W)
    out = jax.block_until_ready(out)

    # Reference in plain JAX with the same op order as the torch module.
    x_proj = x[:, None] * W[None, :] * 2.0 * jnp.pi
    ref = jnp.concatenate([jnp.sin(x_proj), jnp.cos(x_proj)], axis=-1)

    assert out.shape == (batch, embed_dim), out.shape
    assert out.dtype == jnp.float32, out.dtype
    # Arguments reach |2*pi*scale| ~ 190, so a few f32 ulps of argument noise
    # between the in-kernel and XLA sin/cos maps to ~1e-5 absolute; 1e-4 is a
    # tight-but-robust bound on values in [-1, 1].
    assert jnp.allclose(out, ref, atol=1e-4, rtol=1e-4), "mismatch vs reference"

    print("KERNEL_OK")
</pallas_src>

<mosaic_0001>
module attributes {stable_mosaic.version = 11 : i64} {
  func.func @_gfp_kernel(%arg0: i32, %arg1: memref<8x1xf32, #tpu.memory_space<vmem>>, %arg2: memref<1x128xf32, #tpu.memory_space<vmem>>, %arg3: memref<8x256xf32, #tpu.memory_space<vmem>>) attributes {dimension_semantics = [#tpu.dimension_semantics<parallel>], iteration_bounds = array<i64: 1>, scalar_prefetch = 0 : i64, scratch_operands = 0 : i64, tpu.core_type = #tpu.core_type<tc>, window_params = [{transform_indices = @transform_0, window_bounds = array<i64: 8, 1>}, {pipeline_mode = #tpu.pipeline_mode<synchronous>, transform_indices = @transform_1, window_bounds = array<i64: 1, 128>}, {transform_indices = @transform_2, window_bounds = array<i64: 8, 256>}]} {
    %c0 = arith.constant 0 : index
    %c0_0 = arith.constant 0 : index
    %0 = vector.load %arg1[%c0, %c0_0] : memref<8x1xf32, #tpu.memory_space<vmem>>, vector<8x1xf32>
    %c0_1 = arith.constant 0 : index
    %c0_2 = arith.constant 0 : index
    %1 = vector.load %arg2[%c0_1, %c0_2] : memref<1x128xf32, #tpu.memory_space<vmem>>, vector<1x128xf32>
    %2 = vector.broadcast %0 : vector<8x1xf32> to vector<8x128xf32>
    %3 = vector.broadcast %1 : vector<1x128xf32> to vector<8x128xf32>
    %4 = arith.mulf %2, %3 : vector<8x128xf32>
    %cst = arith.constant 6.28318548 : f32
    %5 = vector.broadcast %cst : f32 to vector<8x128xf32>
    %6 = arith.mulf %4, %5 : vector<8x128xf32>
    %7 = math.sin %6 : vector<8x128xf32>
    %c0_3 = arith.constant 0 : index
    %c0_4 = arith.constant 0 : index
    %8 = vector.load %arg3[%c0_3, %c0_4] : memref<8x256xf32, #tpu.memory_space<vmem>>, vector<8x128xf32>
    tpu.vector_store %arg3[%c0_3, %c0_4], %7 {strides = array<i32>} : memref<8x256xf32, #tpu.memory_space<vmem>>, vector<8x128xf32>,
    %9 = math.cos %6 : vector<8x128xf32>
    %c0_5 = arith.constant 0 : index
    %c128 = arith.constant 128 : index
    %10 = vector.load %arg3[%c0_5, %c128] : memref<8x256xf32, #tpu.memory_space<vmem>>, vector<8x128xf32>
    tpu.vector_store %arg3[%c0_5, %c128], %9 {strides = array<i32>} : memref<8x256xf32, #tpu.memory_space<vmem>>, vector<8x128xf32>,
    return
  }
  func.func @transform_0(%arg0: i32) -> (i32, i32) {
    %c0_i32 = arith.constant 0 : i32
    %c0_i32_0 = arith.constant 0 : i32
    return %arg0, %c0_i32 : i32, i32
  }
  func.func @transform_1(%arg0: i32) -> (i32, i32) {
    %c0_i32 = arith.constant 0 : i32
    %c0_i32_0 = arith.constant 0 : i32
    %c0_i32_1 = arith.constant 0 : i32
    return %c0_i32, %c0_i32_0 : i32, i32
  }
  func.func @transform_2(%arg0: i32) -> (i32, i32) {
    %c0_i32 = arith.constant 0 : i32
    %c0_i32_0 = arith.constant 0 : i32
    return %arg0, %c0_i32 : i32, i32
  }
}

</mosaic_0001>

<bundles_post_ra>
// kernel: gaussian_fourier_projection.1
= control target key start
LH: loop header
LB: loop body
LE: loop exit
PB: predicated region body
PF: predicated region fallthrough
CT: control target
= control target key end

     0   :  { %v353_v0 = vmov 0   ;;  %v354_v17 = vmov 683565275   ;;  %v355_v19 = vmov 2475754826   ;;  %s448_s0 = inlined_call_operand.vmem [shape: f32[8,1], index: 0, kind: input, shape index: {}]   ;;  %s449_s1 = inlined_call_operand.vmem [shape: f32[1,128], index: 1, kind: input, shape index: {}]   ;;  %s450_s2 = inlined_call_operand.vmem [shape: f32[8,256], index: 2, kind: output, shape index: {}]  }
   0x1   :  { %351 = vset.pattern.permute.xlu0 %v353_v0  ;;  %v11_v1 = vld [vmem:[%s448_s0] sm:$0xff]  ;;  %v356_v22 = vmov 2131351028   ;;  %v357_v25 = vmov 2102212464  }
   0x2   :  { %15 = vperm.xlu0 %351, %v11_v1   ;;  %v352_v2 = vld [vmem:[%s449_s1] ss:$0 sm:$0xff]  ;;  %v358_v28 = vmov 920167782   ;;  %v359_v31 = vmov 1326507024  }
  0x74   :  { %v16_v3 = vpop.permute.xlu0 %15 }
  0x75   :  { %v21_v4 = vmul.f32 %v352_v2, %v16_v3 }
  0x77   :  { %v382_v5 = vmul.f32 6.2831855, %v21_v4 }
  0x79   :  { %v26_v6 = vand.u32 2139095040, %v382_v5  ;;  %v23_v9 = vand.u32 2147483647, %v382_v5  ;;  %vm25_vm12 = vcmp.lt.s32.totalorder %v382_v5, 0 }
  0x7b   :  { %v27_v7 = vshrl.u32 %v26_v6, 23  ;;  %v30_v11 = vand.u32 8388607, %v23_v9  ;;  %vm24_vm13 = vcmp.le.f32.partialorder %v23_v9, 0.7853982 }
  0x7d   :  { %v338_v8 = vadd.s32 4294967169, %v27_v7  ;;  %v31_v15 = vor.u32 8388608, %v30_v11 }
  0x7f   :  { %v33_v10 = vadd.s32 1, %v338_v8  ;;  %v399_v38 = vshll.u32 %v31_v15, 8 }
  0x81   :  { %vm34_vm0 = vcmp.gt.s32.totalorder %v33_v10, 0  ;;  %v72_v47 = vand.u32 65535, %v399_v38  ;;  %v73_v48 = vshrl.u32 %v399_v38, 16 }
  0x82   :  { %v35_v12 = vsel %vm34_vm0, %v33_v10, 0 }
  0x83   :  { %v37_v13 = vand.u32 31, %v35_v12  ;;  %v390_v16 = vshrl.u32 %v35_v12, 5 }
  0x85   :  { %v388_v14 = vsub.s32 32, %v37_v13  ;;  %v40_v18 = vshll.u32 %v354_v17, %v37_v13  ;;  %v43_v20 = vshll.u32 %v355_v19, %v37_v13  ;;  %v46_v24 = vshll.u32 %v356_v22, %v37_v13 }
  0x86   :  { %v49_v27 = vshll.u32 %v357_v25, %v37_v13  ;;  %v52_v30 = vshll.u32 %v358_v28, %v37_v13  ;;  %vm55_vm1 = vcmp.lt.s32.totalorder %v390_v16, 1  ;;  %vm58_vm2 = vcmp.lt.s32.totalorder %v390_v16, 4 }
  0x87   :  { %v41_v21 = vshrl.u32 %v355_v19, %v388_v14  ;;  %v44_v23 = vshrl.u32 %v356_v22, %v388_v14  ;;  %v47_v26 = vshrl.u32 %v357_v25, %v388_v14  ;;  %v50_v29 = vshrl.u32 %v358_v28, %v388_v14 }
  0x88   :  { %v53_v32 = vshrl.u32 %v359_v31, %v388_v14  ;;  %vm57_vm3 = vcmp.lt.s32.totalorder %v390_v16, 3  ;;  %vm56_vm4 = vcmp.lt.s32.totalorder %v390_v16, 2  ;;  %v39_v12 = vshrl.u32 %v354_v17, %v388_v14 }
  0x89   :  { %v42_v33 = vor.u32 %v41_v21, %v40_v18  ;;  %v45_v34 = vor.u32 %v44_v23, %v43_v20  ;;  %v48_v35 = vor.u32 %v47_v26, %v46_v24  ;;  %v51_v36 = vor.u32 %v50_v29, %v49_v27 }
  0x8a   :  { %v54_v37 = vor.u32 %v53_v32, %v52_v30 }
  0x8b   :  { %v63_v39 = vsel %vm55_vm1, %v42_v33, %v45_v34  ;;  %v67_v40 = vsel %vm55_vm1, %v45_v34, %v48_v35  ;;  %v64_v41 = vsel %vm58_vm2, %v51_v36, 920167782  ;;  %v60_v8 = vsel %vm58_vm2, %v48_v35, 2102212464 }
  0x8c   :  { %v68_v42 = vsel %vm58_vm2, %v54_v37, 1326507024  ;;  %v65_v43 = vsel %vm57_vm3, %v48_v35, %v64_v41  ;;  %v59_v21 = vsel %vm55_vm1, %v39_v12, %v42_v33  ;;  %v61_v22 = vsel %vm57_vm3, %v45_v34, %v60_v8 }
  0x8d   :  { %v69_v44 = vsel %vm57_vm3, %v51_v36, %v68_v42  ;;  %v66_v45 = vsel %vm56_vm4, %v63_v39, %v65_v43  ;;  %v62_v14 = vsel %vm56_vm4, %v59_v21, %v61_v22 }
  0x8e   :  { %v70_v46 = vsel %vm56_vm4, %v67_v40, %v69_v44  ;;  %v96_v51 = vand.u32 65535, %v66_v45  ;;  %v97_v52 = vshrl.u32 %v66_v45, 16  ;;  %v116_v29 = vmul.u32 %v399_v38, %v62_v14 }
  0x8f   :  { %v74_v49 = vand.u32 65535, %v70_v46  ;;  %v75_v50 = vshrl.u32 %v70_v46, 16  ;;  %vm166_vm4 = vweird.f32 %v382_v5 }
  0x90   :  { %v99_v55 = vmul.u32 %v97_v52, %v72_v47  ;;  %v100_v56 = vmul.u32 %v96_v51, %v73_v48  ;;  %v98_v60 = vmul.u32 %v96_v51, %v72_v47  ;;  %v101_v1 = vmul.u32 %v97_v52, %v73_v48 }
  0x91   :  { %v77_v53 = vmul.u32 %v75_v50, %v72_v47  ;;  %v78_v54 = vmul.u32 %v74_v49, %v73_v48  ;;  %v76_v57 = vmul.u32 %v74_v49, %v72_v47  ;;  %v79_v59 = vmul.u32 %v75_v50, %v73_v48 }
  0x92   :  { %v102_v61 = vshll.u32 %v99_v55, 16  ;;  %v104_v3 = vshll.u32 %v100_v56, 16  ;;  %v103_v19 = vshrl.u32 %v99_v55, 16  ;;  %v105_v25 = vshrl.u32 %v100_v56, 16 }
  0x93   :  { %v80_v58 = vshll.u32 %v77_v53, 16  ;;  %v82_v62 = vshll.u32 %v78_v54, 16  ;;  %v81_v13 = vshrl.u32 %v77_v53, 16  ;;  %v83_v23 = vshrl.u32 %v78_v54, 16 }
  0x94   :  { %vm106_vm6 = vc.u32 %v98_v60, %v102_v61  ;;  %v108_v4 = vadd.s32 %v102_v61, %v98_v60 }
  0x95   :  { %vm84_vm5 = vc.u32 %v76_v57, %v80_v58  ;;  %v86_v63 = vadd.s32 %v80_v58, %v76_v57  ;;  %v107_v7 = vsel %vm106_vm6, 1, %v353_v0 }
  0x96   :  { %v85_v2 = vsel %vm84_vm5, 1, %v353_v0  ;;  %v109_v11 = vadd.s32 %v107_v7, %v101_v1  ;;  %vm110_vm8 = vc.u32 %v108_v4, %v104_v3  ;;  %v112_v28 = vadd.s32 %v108_v4, %v104_v3 }
  0x97   :  { %v87_v6 = vadd.s32 %v85_v2, %v79_v59  ;;  %vm88_vm7 = vc.u32 %v86_v63, %v82_v62  ;;  %v111_v18 = vsel %vm110_vm8, 1, %v353_v0 }
  0x98   :  { %v89_v10 = vsel %vm88_vm7, 1, %v353_v0  ;;  %v113_v20 = vadd.s32 %v111_v18, %v109_v11 }
  0x99   :  { %v91_v15 = vadd.s32 %v89_v10, %v87_v6 }
  0x9a   :  { %v114_v26 = vadd.s32 %v113_v20, %v103_v19 }
  0x9b   :  { %v92_v24 = vadd.s32 %v91_v15, %v81_v13 }
  0x9c   :  { %v115_v17 = vadd.s32 %v114_v26, %v105_v25 }
  0x9d   :  { %v93_v27 = vadd.s32 %v92_v24, %v83_v23 }
  0x9e   :  { %v119_v0 = vadd.s32 1, %v115_v17 }
  0x9f   :  { %vm118_vm9 = vc.u32 %v93_v27, %v112_v28  ;;  %v117_v16 = vadd.s32 %v112_v28, %v93_v27 }
  0xa0   :  { %v120_v30 = vsel %vm118_vm9, %v119_v0, %v115_v17 }
  0xa1   :  { %v121_v31 = vadd.s32 %v120_v30, %v116_v29 }
  0xa3   :  { %v122_v32 = vadd.s32 536870912, %v121_v31 }
  0xa5   :  { %v123_v33 = vshrl.u32 %v122_v32, 30 }
  0xa7   :  { %v124_v35 = vshll.u32 %v123_v33, 30  ;;  %v147_v54 = vsub.s32 4, %v123_v33 }
  0xa9   :  { %v125_v34 = vsub.s32 %v121_v31, %v124_v35  ;;  %v148_v59 = vsel %vm25_vm12, %v147_v54, %v123_v33 }
  0xaa   :  { %v150_v62 = vsel %vm24_vm13, 0, %v148_v59 }
  0xab   :  { %vm126_vm10 = vcmp.lt.s32.totalorder %v125_v34, 0  ;;  %v127_v36 = vsub.s32 0, %v125_v34  ;;  %v167_v4 = vadd.s32 3, %v150_v62  ;;  %v323_v10 = vand.u32 3, %v150_v62 }
  0xad   :  { %v128_v37 = vsel %vm126_vm10, %v127_v36, %v125_v34  ;;  %v168_v11 = vand.u32 3, %v167_v4  ;;  %vm324_vm14 = vcmp.lt.s32.totalorder %v323_v10, 2  ;;  %vm325_vm15 = vcmp.eq.s32.totalorder %v323_v10, 0 }
  0xae   :  { %v129_v39 = vclz %v128_v37  ;;  %vm328_vm3 = vcmp.eq.s32.totalorder %v323_v10, 2 }
  0xaf   :  { %vm169_vm0 = vcmp.lt.s32.totalorder %v168_v11, 2  ;;  %vm170_vm1 = vcmp.eq.s32.totalorder %v168_v11, 0  ;;  %vm173_vm2 = vcmp.eq.s32.totalorder %v168_v11, 2 }
  0xb0   :  { %v339_v40 = vadd.s32 4294967294, %v129_v39 }
  0xb2   :  { %vm340_vm11 = vcmp.lt.s32.totalorder %v339_v40, 0 }
  0xb3   :  { %v132_v41 = vsel %vm340_vm11, 0, %v339_v40 }
  0xb4   :  { %v133_v42 = vsub.s32 32, %v132_v41  ;;  %v137_v43 = vsub.s32 4294967266, %v132_v41  ;;  %v134_v44 = vshll.u32 %v125_v34, %v132_v41 }
  0xb6   :  { %v135_v45 = vshrl.u32 %v117_v16, %v133_v42  ;;  %v138_v46 = vadd.s32 127, %v137_v43 }
  0xb8   :  { %v136_v38 = vor.u32 %v135_v45, %v134_v44  ;;  %v139_v47 = vshll.u32 %v138_v46, 23 }
  0xba   :  { %v140_v48 = vor.u32 4788187, %v139_v47  ;;  %v143_v50 = vcvt.s32.f32 %v136_v38 }
  0xbc   :  { %v141_v49 = vand.u32 2147483647, %v140_v48 }
  0xbe   :  { %v144_v51 = vmul.f32 %v143_v50, %v141_v49 }
  0xc0   :  { %v145_v52 = vxor.u32 2147483648, %v144_v51 }
  0xc2   :  { %v146_v53 = vsel %vm25_vm12, %v145_v52, %v144_v51 }
  0xc3   :  { %v149_v55 = vsel %vm24_vm13, %v382_v5, %v146_v53 }
  0xc4   :  { %v151_v56 = vmul.f32 %v149_v55, %v149_v55 }
  0xc6   :  { %v152_v57 = vmul.f32 -0.001358992, %v151_v56  ;;  %v159_v58 = vmul.f32 -0.00019511016, %v151_v56 }
  0xc8   :  { %v153_v60 = vadd.f32 0.041655596, %v152_v57  ;;  %v160_v61 = vadd.f32 0.008332121, %v159_v58 }
  0xca   :  { %v154_v63 = vmul.f32 %v153_v60, %v151_v56  ;;  %v161_v1 = vmul.f32 %v160_v61, %v151_v56 }
  0xcc   :  { %v155_v2 = vadd.f32 -0.4999988, %v154_v63  ;;  %v162_v3 = vadd.f32 -0.16666654, %v161_v1 }
  0xce   :  { %v156_v6 = vmul.f32 %v155_v2, %v151_v56  ;;  %v163_v7 = vmul.f32 %v162_v3, %v151_v56 }
  0xd0   :  { %v157_v8 = vadd.f32 1.0, %v156_v6  ;;  %v164_v9 = vadd.f32 1.0, %v163_v7 }
  0xd2   :  { %v165_v12 = vmul.f32 %v164_v9, %v149_v55  ;;  %v174_v13 = vxor.u32 2147483648, %v157_v8 }
  0xd4   :  { %v171_v15 = vxor.u32 2147483648, %v165_v12  ;;  %v175_v19 = vsel %vm173_vm2, %v174_v13, %v165_v12  ;;  %v330_v21 = vsel %vm328_vm3, %v174_v13, %v165_v12 }
  0xd6   :  { %v172_v18 = vsel %vm170_vm1, %v157_v8, %v171_v15  ;;  %v327_v20 = vsel %vm325_vm15, %v157_v8, %v171_v15 }
  0xd7   :  { %v176_v22 = vsel %vm169_vm0, %v172_v18, %v175_v19  ;;  %v331_v23 = vsel %vm324_vm14, %v327_v20, %v330_v21 }
  0xd8   :  { %v177_v24 = vsel %vm166_vm4, nan, %v176_v22  ;;  %v332_v25 = vsel %vm166_vm4, nan, %v331_v23 }
  0xd9   :  { %178 = vst [vmem:[%s450_s2] sm:$0xff] %v177_v24 }
  0xda   :  { %333 = vst [vmem:[%s450_s2 + $0x8] sm:$0xff] %v332_v25 }

</bundles_post_ra>
